<compile_context>
chip_gen: v7x
topology: tpu7x:2x2x1
jax: 0.10.0
libtpu: 0.0.40
codegen_flags: <defaults>
</compile_context>

<pallas_src>
import jax
import jax.numpy as jnp
from jax.experimental import pallas as pl
from jax.experimental.pallas import tpu as pltpu


def _round_up(x, m):
    return (x + m - 1) // m * m


def _leaky_relu(x, slope=0.01):
    # F.leaky_relu default negative_slope = 0.01 ; vmax + vmul on the VPU.
    return jnp.maximum(x, slope * x)


def _as_bf16(a):
    return a if a.dtype == jnp.bfloat16 else a.astype(jnp.bfloat16)


def mlp_kernel(x_ref, w1_ref, b1_ref, w2_ref, b2_ref, w3_ref, b3_ref, o_ref):
    # x_ref: (TB, obs) f32 streamed tile; cast to bf16 in VMEM (VPU cast is
    # free vs. the extra HBM pass a wrapper-side cast would add).
    x = x_ref[...].astype(jnp.bfloat16)

    # Layer 1: (TB, obs) @ (obs, 128) -> f32 accum; bias + leaky_relu in f32.
    h1 = jnp.dot(x, w1_ref[...], preferred_element_type=jnp.float32)
    h1 = _leaky_relu(h1 + b1_ref[...])

    # Layer 2: (TB, 128) @ (128, 64)
    h2 = jnp.dot(h1.astype(jnp.bfloat16), w2_ref[...],
                 preferred_element_type=jnp.float32)
    h2 = _leaky_relu(h2 + b2_ref[...])

    # Layer 3: (TB, 64) @ (64, out)  (no activation)
    out = jnp.dot(h2.astype(jnp.bfloat16), w3_ref[...],
                  preferred_element_type=jnp.float32) + b3_ref[...]
    o_ref[...] = out.astype(o_ref.dtype)


def _choose_batch_tiling(B, tb):
    """Pick (TB, Bp): batch tile (multiple of 16) and padded batch size.

    Prefers tiles that evenly divide the 16-aligned batch (no extra pad copy),
    and >=2 grid steps when the batch allows (v7x megacore sharding)."""
    Bp16 = _round_up(max(B, 1), 16)
    tb = max(16, _round_up(tb, 16))

    if Bp16 <= tb:
        if Bp16 >= 32:
            m = Bp16 // 16
            # Largest proper divisor of m -> even >=2-way split, no extra pad,
            # as long as it doesn't explode into many tiny steps.
            for d in range(m // 2, 0, -1):
                if m % d == 0:
                    if 16 * d * 8 >= Bp16:
                        return 16 * d, Bp16
                    break
            # m is prime-ish: ceil-split into 2 tiles, pad to the tile multiple.
            TB = _round_up(-(-Bp16 // 2), 16)
            return TB, _round_up(Bp16, TB)
        return Bp16, Bp16

    # Large batch: prefer a multiple-of-16 tile near the target that divides
    # Bp16 (avoids a full jnp.pad pass over obs).
    m = Bp16 // 16
    lo = max(1, tb // 32)
    for d in range(tb // 16, lo - 1, -1):
        if m % d == 0:
            return 16 * d, Bp16
    # No clean divisor near the target: pad the batch up to a tile multiple.
    return tb, _round_up(Bp16, tb)


def _obs_spec(TB, obs_size, n_steps):
    idx = lambda i: (i, 0)
    # Deeper pipelining only pays when tiles are small (per-step compute is a
    # few hundred cycles, so 2-deep buffering can expose DMA issue latency).
    if n_steps >= 2 and TB <= 512:
        try:
            return pl.BlockSpec((TB, obs_size), idx,
                                pipeline_mode=pl.Buffered(3))
        except (TypeError, AttributeError):
            pass
    return pl.BlockSpec((TB, obs_size), idx)


def prepare_params(params):
    """One-time conversion: weights -> bf16 (MXU operand dtype), biases f32.
    Cache the result across training steps to avoid per-call casts."""
    return {
        "w1": _as_bf16(params["w1"]),
        "w2": _as_bf16(params["w2"]),
        "w3": _as_bf16(params["w3"]),
        "b1": params["b1"].astype(jnp.float32),
        "b2": params["b2"].astype(jnp.float32),
        "b3": params["b3"].astype(jnp.float32),
    }


def feature_extractor(obs, params, *, tb=2048):
    """obs: (B, obs_size) float32. params: dict (raw f32 or prepare_params output)."""
    B, obs_size = obs.shape
    out_size = params["w3"].shape[1]

    # Accept pre-cast bf16 params (preferred; hoist prepare_params out of the
    # training loop) or cast here as a fallback.
    w1, w2, w3 = _as_bf16(params["w1"]), _as_bf16(params["w2"]), _as_bf16(params["w3"])
    b1, b2, b3 = params["b1"], params["b2"], params["b3"]

    TB, Bp = _choose_batch_tiling(B, tb)
    n_steps = Bp // TB
    # Only materialize a padded copy when the batch isn't tile-aligned.
    obs_p = obs if Bp == B else jnp.pad(obs, ((0, Bp - B), (0, 0)))

    # Weights/biases: constant index_map -> VMEM-resident across grid steps.
    const2d = lambda a: pl.BlockSpec(a.shape, lambda i: (0, 0))

    out = pl.pallas_call(
        mlp_kernel,
        out_shape=jax.ShapeDtypeStruct((Bp, out_size), jnp.float32),
        grid=(n_steps,),
        in_specs=[
            _obs_spec(TB, obs_size, n_steps),   # streamed f32 obs tile (cast in-kernel)
            const2d(w1), const2d(b1),
            const2d(w2), const2d(b2),
            const2d(w3), const2d(b3),
        ],
        # TODO(synk): out_size=16 < 128 lanes -> masked vst / lane-padded output
        # writeback; if the downstream consumer accepted a (B, 128) bf16 slab
        # (w3/b3 zero-padded to 128 cols), the store would be lane-dense and
        # markedly cheaper. Kept (B, out_size) f32 to match the module contract.
        out_specs=pl.BlockSpec((TB, out_size), lambda i: (i, 0)),
        compiler_params=pltpu.CompilerParams(
            dimension_semantics=("parallel",)),   # v7x: shard batch across 2 TCs
    )(obs_p, w1, b1, w2, b2, w3, b3)

    return out[:B] if Bp != B else out


def init_params(key, obs_size, out_size):
    """Deterministic synthetic init mimicking nn.Linear shapes.
    Weights stored as (in, out) = W.T relative to PyTorch's (out, in)."""
    ks = jax.random.split(key, 6)

    def lin(kw, kb, fan_in, fan_out):
        bound = 1.0 / jnp.sqrt(jnp.float32(fan_in))
        w = jax.random.uniform(kw, (fan_in, fan_out), jnp.float32, -bound, bound)
        b = jax.random.uniform(kb, (1, fan_out), jnp.float32, -bound, bound)
        return w, b

    w1, b1 = lin(ks[0], ks[1], obs_size, 128)
    w2, b2 = lin(ks[2], ks[3], 128, 64)
    w3, b3 = lin(ks[4], ks[5], 64, out_size)
    return {"w1": w1, "b1": b1, "w2": w2, "b2": b2, "w3": w3, "b3": b3}


def reference(obs, p):
    """Pure f32 reference matching the PyTorch module."""
    h = obs @ p["w1"] + p["b1"]
    h = jnp.maximum(h, 0.01 * h)
    h = h @ p["w2"] + p["b2"]
    h = jnp.maximum(h, 0.01 * h)
    return h @ p["w3"] + p["b3"]


if __name__ == "__main__":
    key = jax.random.PRNGKey(0)
    k_obs, k_params, k_obs2 = jax.random.split(key, 3)

    obs_size, out_size = 32, 16
    params = init_params(k_params, obs_size, out_size)
    params_bf = prepare_params(params)   # hoisted bf16 cast (done once)

    # Small primary check (typical tiny RL batch): single 16-row tile.
    obs = jax.random.normal(k_obs, (8, obs_size), jnp.float32)
    out = jax.block_until_ready(feature_extractor(obs, params_bf))
    ref = reference(obs, params)
    assert out.shape == (8, out_size)
    # bf16 MXU operands with f32 accumulation -> loosened tolerance vs f32 ref.
    assert jnp.allclose(out, ref, atol=2e-2, rtol=2e-2), \
        f"max abs err {float(jnp.max(jnp.abs(out - ref)))}"

    # Multi-step grid + ragged batch: exercises pipelining (Buffered path),
    # megacore-parallel grid, and the padded-tail slice.
    obs2 = jax.random.normal(k_obs2, (40, obs_size), jnp.float32)
    out2 = jax.block_until_ready(feature_extractor(obs2, params_bf, tb=16))
    ref2 = reference(obs2, params)
    assert out2.shape == (40, out_size)
    assert jnp.allclose(out2, ref2, atol=2e-2, rtol=2e-2), \
        f"max abs err {float(jnp.max(jnp.abs(out2 - ref2)))}"

    print("KERNEL_OK")
</pallas_src>

<mosaic_0001>
module attributes {stable_mosaic.version = 11 : i64} {
  func.func @mlp_kernel(%arg0: i32, %arg1: memref<16x32xf32, #tpu.memory_space<vmem>>, %arg2: memref<32x128xbf16, #tpu.memory_space<vmem>>, %arg3: memref<1x128xf32, #tpu.memory_space<vmem>>, %arg4: memref<128x64xbf16, #tpu.memory_space<vmem>>, %arg5: memref<1x64xf32, #tpu.memory_space<vmem>>, %arg6: memref<64x16xbf16, #tpu.memory_space<vmem>>, %arg7: memref<1x16xf32, #tpu.memory_space<vmem>>, %arg8: memref<16x16xf32, #tpu.memory_space<vmem>>) attributes {dimension_semantics = [#tpu.dimension_semantics<parallel>], iteration_bounds = array<i64: 1>, scalar_prefetch = 0 : i64, scratch_operands = 0 : i64, tpu.core_type = #tpu.core_type<tc>, window_params = [{transform_indices = @transform_0, window_bounds = array<i64: 16, 32>}, {pipeline_mode = #tpu.pipeline_mode<synchronous>, transform_indices = @transform_1, window_bounds = array<i64: 32, 128>}, {pipeline_mode = #tpu.pipeline_mode<synchronous>, transform_indices = @transform_2, window_bounds = array<i64: 1, 128>}, {pipeline_mode = #tpu.pipeline_mode<synchronous>, transform_indices = @transform_3, window_bounds = array<i64: 128, 64>}, {pipeline_mode = #tpu.pipeline_mode<synchronous>, transform_indices = @transform_4, window_bounds = array<i64: 1, 64>}, {pipeline_mode = #tpu.pipeline_mode<synchronous>, transform_indices = @transform_5, window_bounds = array<i64: 64, 16>}, {pipeline_mode = #tpu.pipeline_mode<synchronous>, transform_indices = @transform_6, window_bounds = array<i64: 1, 16>}, {transform_indices = @transform_7, window_bounds = array<i64: 16, 16>}]} {
    %c0 = arith.constant 0 : index
    %c0_0 = arith.constant 0 : index
    %0 = vector.load %arg1[%c0, %c0_0] : memref<16x32xf32, #tpu.memory_space<vmem>>, vector<16x32xf32>
    %1 = arith.truncf %0 : vector<16x32xf32> to vector<16x32xbf16>
    %c0_1 = arith.constant 0 : index
    %c0_2 = arith.constant 0 : index
    %2 = vector.load %arg2[%c0_1, %c0_2] : memref<32x128xbf16, #tpu.memory_space<vmem>>, vector<32x128xbf16>
    %cst = arith.constant dense<0.000000e+00> : vector<16x128xf32>
    %3 = tpu.matmul %1, %2, %cst {dimension_numbers = #tpu.dot_dimension_numbers<[1], [0], [0], [1], [0, 0, 1, 1], [], []>} : vector<16x32xbf16>, vector<32x128xbf16>, vector<16x128xf32> -> vector<16x128xf32>
    %c0_3 = arith.constant 0 : index
    %c0_4 = arith.constant 0 : index
    %4 = vector.load %arg3[%c0_3, %c0_4] : memref<1x128xf32, #tpu.memory_space<vmem>>, vector<1x128xf32>
    %5 = vector.broadcast %4 : vector<1x128xf32> to vector<16x128xf32>
    %6 = arith.addf %3, %5 : vector<16x128xf32>
    %cst_5 = arith.constant 0.00999999977 : f32
    %7 = vector.broadcast %cst_5 : f32 to vector<16x128xf32>
    %8 = arith.mulf %7, %6 : vector<16x128xf32>
    %9 = arith.maximumf %6, %8 : vector<16x128xf32>
    %10 = arith.truncf %9 : vector<16x128xf32> to vector<16x128xbf16>
    %c0_6 = arith.constant 0 : index
    %c0_7 = arith.constant 0 : index
    %11 = vector.load %arg4[%c0_6, %c0_7] : memref<128x64xbf16, #tpu.memory_space<vmem>>, vector<128x64xbf16>
    %cst_8 = arith.constant dense<0.000000e+00> : vector<16x64xf32>
    %12 = tpu.matmul %10, %11, %cst_8 {dimension_numbers = #tpu.dot_dimension_numbers<[1], [0], [0], [1], [0, 0, 1, 1], [], []>} : vector<16x128xbf16>, vector<128x64xbf16>, vector<16x64xf32> -> vector<16x64xf32>
    %c0_9 = arith.constant 0 : index
    %c0_10 = arith.constant 0 : index
    %13 = vector.load %arg5[%c0_9, %c0_10] : memref<1x64xf32, #tpu.memory_space<vmem>>, vector<1x64xf32>
    %14 = vector.broadcast %13 : vector<1x64xf32> to vector<16x64xf32>
    %15 = arith.addf %12, %14 : vector<16x64xf32>
    %cst_11 = arith.constant 0.00999999977 : f32
    %16 = vector.broadcast %cst_11 : f32 to vector<16x64xf32>
    %17 = arith.mulf %16, %15 : vector<16x64xf32>
    %18 = arith.maximumf %15, %17 : vector<16x64xf32>
    %19 = arith.truncf %18 : vector<16x64xf32> to vector<16x64xbf16>
    %c0_12 = arith.constant 0 : index
    %c0_13 = arith.constant 0 : index
    %20 = vector.load %arg6[%c0_12, %c0_13] : memref<64x16xbf16, #tpu.memory_space<vmem>>, vector<64x16xbf16>
    %cst_14 = arith.constant dense<0.000000e+00> : vector<16x16xf32>
    %21 = tpu.matmul %19, %20, %cst_14 {dimension_numbers = #tpu.dot_dimension_numbers<[1], [0], [0], [1], [0, 0, 1, 1], [], []>} : vector<16x64xbf16>, vector<64x16xbf16>, vector<16x16xf32> -> vector<16x16xf32>
    %c0_15 = arith.constant 0 : index
    %c0_16 = arith.constant 0 : index
    %22 = vector.load %arg7[%c0_15, %c0_16] : memref<1x16xf32, #tpu.memory_space<vmem>>, vector<1x16xf32>
    %23 = vector.broadcast %22 : vector<1x16xf32> to vector<16x16xf32>
    %24 = arith.addf %21, %23 : vector<16x16xf32>
    %c0_17 = arith.constant 0 : index
    %c0_18 = arith.constant 0 : index
    %25 = vector.load %arg8[%c0_17, %c0_18] : memref<16x16xf32, #tpu.memory_space<vmem>>, vector<16x16xf32>
    tpu.vector_store %arg8[%c0_17, %c0_18], %24 {strides = array<i32>} : memref<16x16xf32, #tpu.memory_space<vmem>>, vector<16x16xf32>,
    return
  }
  func.func @transform_0(%arg0: i32) -> (i32, i32) {
    %c0_i32 = arith.constant 0 : i32
    %c0_i32_0 = arith.constant 0 : i32
    return %arg0, %c0_i32 : i32, i32
  }
  func.func @transform_1(%arg0: i32) -> (i32, i32) {
    %c0_i32 = arith.constant 0 : i32
    %c0_i32_0 = arith.constant 0 : i32
    %c0_i32_1 = arith.constant 0 : i32
    return %c0_i32, %c0_i32_0 : i32, i32
  }
  func.func @transform_2(%arg0: i32) -> (i32, i32) {
    %c0_i32 = arith.constant 0 : i32
    %c0_i32_0 = arith.constant 0 : i32
    %c0_i32_1 = arith.constant 0 : i32
    return %c0_i32, %c0_i32_0 : i32, i32
  }
  func.func @transform_3(%arg0: i32) -> (i32, i32) {
    %c0_i32 = arith.constant 0 : i32
    %c0_i32_0 = arith.constant 0 : i32
    %c0_i32_1 = arith.constant 0 : i32
    return %c0_i32, %c0_i32_0 : i32, i32
  }
  func.func @transform_4(%arg0: i32) -> (i32, i32) {
    %c0_i32 = arith.constant 0 : i32
    %c0_i32_0 = arith.constant 0 : i32
    %c0_i32_1 = arith.constant 0 : i32
    return %c0_i32, %c0_i32_0 : i32, i32
  }
  func.func @transform_5(%arg0: i32) -> (i32, i32) {
    %c0_i32 = arith.constant 0 : i32
    %c0_i32_0 = arith.constant 0 : i32
    %c0_i32_1 = arith.constant 0 : i32
    return %c0_i32, %c0_i32_0 : i32, i32
  }
  func.func @transform_6(%arg0: i32) -> (i32, i32) {
    %c0_i32 = arith.constant 0 : i32
    %c0_i32_0 = arith.constant 0 : i32
    %c0_i32_1 = arith.constant 0 : i32
    return %c0_i32, %c0_i32_0 : i32, i32
  }
  func.func @transform_7(%arg0: i32) -> (i32, i32) {
    %c0_i32 = arith.constant 0 : i32
    %c0_i32_0 = arith.constant 0 : i32
    return %arg0, %c0_i32 : i32, i32
  }
}

</mosaic_0001>

<bundles_post_ra>
// kernel: tpu_custom_call.1
= control target key start
LH: loop header
LB: loop body
LE: loop exit
PB: predicated region body
PF: predicated region fallthrough
CT: control target
= control target key end

     0   :  { %v443_v1 = vmov 0.0   ;;  %vm444_vm0 = vmmov 0   ;;  %vm54_vm1 = vcmask 261120   ;;  %s560_s0 = inlined_call_operand.vmem [shape: f32[16,32], index: 0, kind: input, shape index: {}]   ;;  %s561_s1 = inlined_call_operand.vmem [shape: bf16[32,128], index: 1, kind: input, shape index: {}]   ;;  %s562_s2 = inlined_call_operand.vmem [shape: f32[1,128], index: 2, kind: input, shape index: {}]   ;;  %s563_s3 = inlined_call_operand.vmem [shape: bf16[128,64], index: 3, kind: input, shape index: {}]   ;;  %s564_s4 = inlined_call_operand.vmem [shape: f32[1,64], index: 4, kind: input, shape index: {}]   ;;  %s565_s5 = inlined_call_operand.vmem [shape: bf16[64,16], index: 5, kind: input, shape index: {}]   ;;  %s566_s6 = inlined_call_operand.vmem [shape: f32[1,16], index: 6, kind: input, shape index: {}]   ;;  %s567_s7 = inlined_call_operand.hbm [shape: f32[16,16], index: 7, kind: output, shape index: {}]  }
   0x1   :  { %v405_v0 = vld [vmem:[%s561_s1] sm:$0xff]   ;;  %360 = vmatprep.subr.bf16.mxu0 %v443_v1  ;;  %v406_v2 = vld [vmem:[%s561_s1 + $0x8] sm:$0xff]   ;;  %368 = vmatprep.subr.bf16.mxu1 %v443_v1  ;;  %v409_v8 = vld [vmem:[%s563_s3 + $0x10] sm:$0xff]  }
   0x2   :  { %361 = vmatpush3.bf16.msra.mxu0 %v405_v0  ;;  %364 = vmatprep.mubr.msk.bf16.mxu0 %vm444_vm0, %v443_v1  ;;  %v28_v3 = vld [vmem:[%s560_s0] sm:$0xff]  ;;  %v29_v4 = vld [vmem:[%s560_s0 + $0x8] sm:$0xff] }
   0x3   :  { %362 = vmatprep.subr.bf16.mxu0 %v443_v1  ;;  %v407_v5 = vld [vmem:[%s563_s3] sm:$0xff]   ;;  %384 = vmatprep.mubr.msk.bf16.mxu1 %vm444_vm0, %v443_v1  ;;  %v30_v6 = vpack.c.bf16 %v29_v4, %v28_v3  ;;  %v408_v7 = vld [vmem:[%s563_s3 + $0x8] sm:$0xff]  }
   0x4   :  { %369 = vmatpush3.bf16.msra.mxu1 %v407_v5 }
   0x5   :  { %370 = vmatprep.subr.bf16.mxu1 %v443_v1 }
   0x6   :  { %363 = vmatpush3.bf16.msra.mxu0 %v406_v2 }
   0x7   :  { %388 = vmatprep.subr.bf16.mxu0 %v443_v1 }
   0x8   :  { %371 = vmatpush3.bf16.msra.mxu1 %v408_v7 }
   0x9   :  { %365 = vmatmul.mubr.msk.bf16.vlgmr.msra.gmra.mrb[0].mxu0 %vm54_vm1, %v30_v6  ;;  %372 = vmatprep.subr.bf16.mxu1 %v443_v1 }
   0xa   :  { %396 = vmatprep.mubr.msk.bf16.mxu0 %vm444_vm0, %v443_v1 }
   0xb   :  { %12 = vsyncpa [#allocation3], 0  ;;  %v410_v9 = vld [vmem:[%s563_s3 + $0x18] sm:$0xff]   ;;  %v411_v10 = vld [vmem:[%s563_s3 + $0x20] sm:$0xff]   ;;  %vm260_vm2 = vcmask 523264   ;;  %s445_s1 = smov [#allocation2]  }
   0xc   :  { %373 = vmatpush3.bf16.msra.mxu1 %v409_v8  ;;  %v412_v11 = vld [vmem:[%s563_s3 + $0x28] sm:$0xff]   ;;  %v413_v12 = vld [vmem:[%s563_s3 + $0x30] sm:$0xff]   ;;  %v414_v13 = vld [vmem:[%s563_s3 + $0x38] sm:$0xff]   ;;  %s313_s11 = sshll.u32 %s445_s1, 4  ;;  %vm305_vm3 = vcmask 130048   ;;  %s314_s11 = int_to_ptr.vmem [resolvable:$true] %s313_s11 }
   0xd   :  { %374 = vmatprep.subr.bf16.mxu1 %v443_v1  ;;  %v415_v14 = vld [vmem:[%s565_s5] sm:$0xff]   ;;  %v416_v27 = vld [vmem:[%s565_s5 + $0x8] sm:$0xff]   ;;  %v417_v28 = vld [vmem:[%s565_s5 + $0x10] sm:$0xff]   ;;  %p424_p1 = scmp.lt.s32.totalorder %s314_s11, %s314_s11 }
   0xe   :  { %389 = vmatpush3.bf16.msra.mxu0 %v415_v14  ;;  %v324_v15 = vld [vmem:[%s562_s2] ss:$0 sm:$0xff]  ;;  %v418_v29 = vld [vmem:[%s565_s5 + $0x18] sm:$0xff]  }
   0xf   :  { %390 = vmatprep.subr.bf16.mxu0 %v443_v1  ;;  %v328_v30 = vld [vmem:[%s564_s4] ss:$0 sm:$0xff]  ;;  %s419_s4 = scalar_lea.vmem %s314_s11, 256 }
  0x10   :  { %375 = vmatpush3.bf16.msra.mxu1 %v410_v9  ;;  %v337_v42 = vld [vmem:[%s566_s6] ss:$0 sm:$0xff]  ;;  %p420_p0 = scmp.ne.s32.totalorder %s314_s11, %s419_s4  ;;  %p425_p2 = scmp.lt.s32.totalorder %s419_s4, %s419_s4 }
  0x11   :  { %376 = vmatprep.subr.bf16.mxu1 %v443_v1 }
  0x12   :  { %391 = vmatpush3.bf16.msra.mxu0 %v416_v27  ;;  %p426_p3 = por %p425_p2, %p424_p1 }
  0x13   :  { %392 = vmatprep.subr.bf16.mxu0 %v443_v1 }
  0x14   :  { %377 = vmatpush3.bf16.msra.mxu1 %v411_v10  ;;  %p427_p4 = pnand %p426_p3, %p420_p0 }
  0x15   :  { %378 = vmatprep.subr.bf16.mxu1 %v443_v1 }
  0x16   :  { %393 = vmatpush3.bf16.msra.mxu0 %v417_v28 }
  0x17   :  { %394 = vmatprep.subr.bf16.mxu0 %v443_v1 }
  0x18   :  { %379 = vmatpush3.bf16.msra.mxu1 %v412_v11 }
  0x19   :  { %380 = vmatprep.subr.bf16.mxu1 %v443_v1 }
  0x1a   :  { %395 = vmatpush3.bf16.msra.mxu0 %v418_v29 }
  0x1c   :  { %381 = vmatpush3.bf16.msra.mxu1 %v413_v12 }
  0x1d   :  { %382 = vmatprep.subr.bf16.mxu1 %v443_v1 }
  0x20   :  { %383 = vmatpush3.bf16.msra.mxu1 %v414_v13 }
  0xdc   :  { %v92_v16 = vpop.f32.mrb[0].mxu0 }
  0xdd   :  { %v93_v17 = vadd.f32 %v324_v15, %v92_v16  ;;  %v366_v18 = vpop.f32.mrb[1].mxu0 }
  0xde   :  { %v95_v19 = vpop.f32.mrb[2].mxu0 }
  0xdf   :  { %v99_v20 = vmul.f32 0.01, %v93_v17  ;;  %v96_v21 = vadd.f32 %v324_v15, %v95_v19  ;;  %v367_v22 = vpop.f32.mrb[3].mxu0 }
  0xe1   :  { %v100_v23 = vmul.f32 0.01, %v96_v21  ;;  %v101_v24 = vmax.f32 %v93_v17, %v99_v20 }
  0xe3   :  { %v102_v25 = vmax.f32 %v96_v21, %v100_v23 }
  0xe5   :  { %v103_v26 = vpack.c.bf16 %v102_v25, %v101_v24 }
  0xe7   :  { %385 = vmatmul.mubr.bf16.vlgmr.msra.gmra.mrb[0].mxu1 %v103_v26 }
 0x1ba   :  { %v209_v31 = vpop.f32.mrb[0].mxu1 }
 0x1bb   :  { %v210_v32 = vadd.f32 %v328_v30, %v209_v31  ;;  %v386_v33 = vpop.f32.mrb[1].mxu1 }
 0x1bc   :  { %v212_v34 = vpop.f32.mrb[2].mxu1 }
 0x1bd   :  { %v216_v35 = vmul.f32 0.01, %v210_v32  ;;  %v213_v36 = vadd.f32 %v328_v30, %v212_v34  ;;  %v387_v37 = vpop.f32.mrb[3].mxu1 }
 0x1bf   :  { %v217_v38 = vmul.f32 0.01, %v213_v36  ;;  %v218_v39 = vmax.f32 %v210_v32, %v216_v35 }
 0x1c1   :  { %v219_v40 = vmax.f32 %v213_v36, %v217_v38 }
 0x1c3   :  { %v220_v41 = vpack.c.bf16 %v219_v40, %v218_v39 }
 0x1c5   :  { %397 = vmatmul.mubr.msk.bf16.vlgmr.msra.gmra.mrb[4].mxu0 %vm260_vm2, %v220_v41 }
 0x298   :  { %v298_v43 = vpop.f32.mrb[4].mxu0 }
 0x299   :  { %v299_v44 = vadd.f32 %v337_v42, %v298_v43  ;;  %v398_v45 = vpop.f32.mrb[5].mxu0 }
 0x29a   :  { %v301_v46 = vpop.f32.mrb[6].mxu0 }
 0x29b   :  { %306 = vst.msk [vmem:[#allocation2] sm:$0xff] %vm305_vm3, %v299_v44  ;;  %v302_v47 = vadd.f32 %v337_v42, %v301_v46  ;;  %v399_v48 = vpop.f32.mrb[7].mxu0 }
 0x29d   :  { %307 = vst.msk [vmem:[#allocation2 + $0x8] sm:$0xff] %vm305_vm3, %v302_v47 }
 0x29e   :  { %430 = shalt.err (!%p427_p4)
}
 0x29f   :  { %s431_s13 = scalar_lea.hbm %s567_s7, 256 }
 0x2a0   :  { %p432_p5 = scmp.ne.s32.totalorder %s567_s7, %s431_s13  ;;  %p435_p6 = scmp.lt.u32.totalorder %s431_s13, %s567_s7 }
 0x2a2   :  { %p437_p7 = pnand %p435_p6, %p432_p5 }
 0x2a4   :  { %440 = shalt.err (!%p437_p7)
}
 0x2a5   :  { %s446_s17 = smov 128   ;;  %s447_s18 = smov 8  }
 0x2a6   :  { %319 = dma.vmem_to_hbm [thread:$0]  %s314_s11, 256, %s567_s7, [#allocation3], %s446_s17, %s446_s17, %s447_s18  }
 0x2a7   :  { %441 = dma.done.wait [#allocation3], 256  }
 0x2a8   :  { %442 = vsyncadd [#allocation3], 4294967040 }
 0x2a9   :  { %323 = vsyncpa [#allocation3], 1 }

</bundles_post_ra>
